<compile_context>
chip_gen: v6e
topology: v6e:2x2x1
jax: 0.10.0
libtpu: 0.0.40
codegen_flags: <defaults>
</compile_context>

<pallas_src>
import jax
import jax.numpy as jnp
from jax.experimental import pallas as pl
from jax.experimental.pallas import tpu as pltpu


def qwenvl_part_a(input_ids, embed_table, *, in_flight=8):
    """Pallas implementation of QwenVL_PartA.forward (embedding gather).

    input_ids:   int32 [..., S]   (any leading batch dims)
    embed_table: [vocab, H]       (the embed_tokens weight, passed explicitly)
    returns:     [..., S, H]      same dtype as embed_table
    """
    assert in_flight > 0 and (in_flight & (in_flight - 1)) == 0, "in_flight must be a power of two"
    lead_shape = input_ids.shape
    ids_flat = input_ids.reshape(-1).astype(jnp.int32)
    n_tok = int(ids_flat.shape[0])
    vocab, hidden = embed_table.shape
    n_prime = min(in_flight, n_tok)
    out_dtype = embed_table.dtype

    def gather_kernel(ids_ref, table_ref, out_ref, sems):
        # ids_ref:   SMEM [n_tok] int32        (scalar-indexed token ids)
        # table_ref: HBM  [vocab, hidden]      (never copied wholesale to VMEM)
        # out_ref:   HBM  [n_tok, hidden]      (written directly by DMA)
        # sems:      DMA semaphores [in_flight]
        def row_dma(tok, slot):
            return pltpu.make_async_copy(
                table_ref.at[ids_ref[tok]],   # dynamic source row in HBM
                out_ref.at[tok],              # destination row in HBM
                sems.at[slot])

        # Prime the pipeline: up to `in_flight` row copies outstanding.
        for t in range(n_prime):              # tiny static unroll (slot == t here)
            row_dma(t, t).start()

        @pl.loop(0, n_tok)
        def _(t):
            slot = t & (in_flight - 1)
            # Retire the copy for token t ...
            row_dma(t, slot).wait()
            # ... then immediately refill the slot with token t + in_flight.
            @pl.when(t + in_flight < n_tok)
            def _():
                row_dma(t + in_flight, slot).start()

    bytes_moved = n_tok * 4 + 2 * n_tok * hidden * jnp.dtype(out_dtype).itemsize
    out_flat = pl.pallas_call(
        gather_kernel,
        out_shape=jax.ShapeDtypeStruct((n_tok, hidden), out_dtype),
        in_specs=[
            pl.BlockSpec(memory_space=pltpu.MemorySpace.SMEM),  # token ids -> SMEM scalars
            pl.BlockSpec(memory_space=pl.ANY),                  # embedding table stays in HBM
        ],
        out_specs=pl.BlockSpec(memory_space=pl.ANY),            # output filled by DMA in HBM
        scratch_shapes=[pltpu.SemaphoreType.DMA((in_flight,))],
        cost_estimate=pl.CostEstimate(
            flops=0, transcendentals=0, bytes_accessed=bytes_moved),
        compiler_params=pltpu.CompilerParams(has_side_effects=True),
    )(ids_flat, embed_table)

    return out_flat.reshape(*lead_shape, hidden)


if __name__ == "__main__":
    key = jax.random.PRNGKey(0)
    k_tab, k_ids = jax.random.split(key)

    # Small shapes consistent with the module's forward: [B, S] int32 ids and
    # a [vocab, H] embedding table.  H=128 keeps output rows lane-dense.
    B, S, VOCAB, H = 2, 8, 512, 128
    embed_table = jax.random.normal(k_tab, (VOCAB, H), dtype=jnp.float32)
    input_ids = jax.random.randint(k_ids, (B, S), 0, VOCAB, dtype=jnp.int32)

    out = qwenvl_part_a(input_ids, embed_table)
    out = jax.block_until_ready(out)

    # Reference: plain gather (mirrors nn.Embedding / embed_tokens semantics).
    ref = jnp.take(embed_table, input_ids, axis=0)
    assert out.shape == (B, S, H)
    assert jnp.array_equal(out, ref), "Pallas output mismatch vs reference"

    print("KERNEL_OK")
</pallas_src>

<mosaic_0001>
module attributes {stable_mosaic.version = 11 : i64} {
  func.func @gather_kernel(%arg0: memref<16xi32, #tpu.memory_space<smem>>, %arg1: memref<512x128xf32, #tpu.memory_space<any>>, %arg2: memref<16x128xf32, #tpu.memory_space<any>>, %arg3: memref<8x!tpu.dma_semaphore, #tpu.memory_space<semaphore_mem>>) attributes {dimension_semantics = [], scalar_prefetch = 0 : i64, scratch_operands = 1 : i64, tpu.core_type = #tpu.core_type<tc>} {
    %c0 = arith.constant 0 : index
    %0 = memref.load %arg0[%c0] : memref<16xi32, #tpu.memory_space<smem>>
    %c0_i32 = arith.constant 0 : i32
    %c0_i32_0 = arith.constant 0 : i32
    %c0_i32_1 = arith.constant 0 : i32
    %1 = tpu.memref_slice %arg1[%0, %c0_i32_1] : memref<512x128xf32, #tpu.memory_space<any>> -> memref<1x128xf32, #tpu.memory_space<any>>
    %2 = tpu.memref_squeeze %1 : memref<1x128xf32, #tpu.memory_space<any>> -> memref<128xf32, #tpu.memory_space<any>>
    %c0_i32_2 = arith.constant 0 : i32
    %3 = tpu.memref_slice %arg2[%c0_i32, %c0_i32_2] : memref<16x128xf32, #tpu.memory_space<any>> -> memref<1x128xf32, #tpu.memory_space<any>>
    %4 = tpu.memref_squeeze %3 : memref<1x128xf32, #tpu.memory_space<any>> -> memref<128xf32, #tpu.memory_space<any>>
    %5 = tpu.memref_slice %arg3[%c0_i32_0] : memref<8x!tpu.dma_semaphore, #tpu.memory_space<semaphore_mem>> -> memref<1x!tpu.dma_semaphore, #tpu.memory_space<semaphore_mem>>
    %6 = tpu.memref_squeeze %5 : memref<1x!tpu.dma_semaphore, #tpu.memory_space<semaphore_mem>> -> memref<!tpu.dma_semaphore, #tpu.memory_space<semaphore_mem>>
    tpu.enqueue_dma source(%2 : memref<128xf32, #tpu.memory_space<any>>) target(%4 : memref<128xf32, #tpu.memory_space<any>>) target_semaphore(%6 : memref<!tpu.dma_semaphore, #tpu.memory_space<semaphore_mem>>)
    %c1 = arith.constant 1 : index
    %7 = memref.load %arg0[%c1] : memref<16xi32, #tpu.memory_space<smem>>
    %c1_i32 = arith.constant 1 : i32
    %c1_i32_3 = arith.constant 1 : i32
    %c0_i32_4 = arith.constant 0 : i32
    %8 = tpu.memref_slice %arg1[%7, %c0_i32_4] : memref<512x128xf32, #tpu.memory_space<any>> -> memref<1x128xf32, #tpu.memory_space<any>>
    %9 = tpu.memref_squeeze %8 : memref<1x128xf32, #tpu.memory_space<any>> -> memref<128xf32, #tpu.memory_space<any>>
    %c0_i32_5 = arith.constant 0 : i32
    %10 = tpu.memref_slice %arg2[%c1_i32, %c0_i32_5] : memref<16x128xf32, #tpu.memory_space<any>> -> memref<1x128xf32, #tpu.memory_space<any>>
    %11 = tpu.memref_squeeze %10 : memref<1x128xf32, #tpu.memory_space<any>> -> memref<128xf32, #tpu.memory_space<any>>
    %12 = tpu.memref_slice %arg3[%c1_i32_3] : memref<8x!tpu.dma_semaphore, #tpu.memory_space<semaphore_mem>> -> memref<1x!tpu.dma_semaphore, #tpu.memory_space<semaphore_mem>>
    %13 = tpu.memref_squeeze %12 : memref<1x!tpu.dma_semaphore, #tpu.memory_space<semaphore_mem>> -> memref<!tpu.dma_semaphore, #tpu.memory_space<semaphore_mem>>
    tpu.enqueue_dma source(%9 : memref<128xf32, #tpu.memory_space<any>>) target(%11 : memref<128xf32, #tpu.memory_space<any>>) target_semaphore(%13 : memref<!tpu.dma_semaphore, #tpu.memory_space<semaphore_mem>>)
    %c2 = arith.constant 2 : index
    %14 = memref.load %arg0[%c2] : memref<16xi32, #tpu.memory_space<smem>>
    %c2_i32 = arith.constant 2 : i32
    %c2_i32_6 = arith.constant 2 : i32
    %c0_i32_7 = arith.constant 0 : i32
    %15 = tpu.memref_slice %arg1[%14, %c0_i32_7] : memref<512x128xf32, #tpu.memory_space<any>> -> memref<1x128xf32, #tpu.memory_space<any>>
    %16 = tpu.memref_squeeze %15 : memref<1x128xf32, #tpu.memory_space<any>> -> memref<128xf32, #tpu.memory_space<any>>
    %c0_i32_8 = arith.constant 0 : i32
    %17 = tpu.memref_slice %arg2[%c2_i32, %c0_i32_8] : memref<16x128xf32, #tpu.memory_space<any>> -> memref<1x128xf32, #tpu.memory_space<any>>
    %18 = tpu.memref_squeeze %17 : memref<1x128xf32, #tpu.memory_space<any>> -> memref<128xf32, #tpu.memory_space<any>>
    %19 = tpu.memref_slice %arg3[%c2_i32_6] : memref<8x!tpu.dma_semaphore, #tpu.memory_space<semaphore_mem>> -> memref<1x!tpu.dma_semaphore, #tpu.memory_space<semaphore_mem>>
    %20 = tpu.memref_squeeze %19 : memref<1x!tpu.dma_semaphore, #tpu.memory_space<semaphore_mem>> -> memref<!tpu.dma_semaphore, #tpu.memory_space<semaphore_mem>>
    tpu.enqueue_dma source(%16 : memref<128xf32, #tpu.memory_space<any>>) target(%18 : memref<128xf32, #tpu.memory_space<any>>) target_semaphore(%20 : memref<!tpu.dma_semaphore, #tpu.memory_space<semaphore_mem>>)
    %c3 = arith.constant 3 : index
    %21 = memref.load %arg0[%c3] : memref<16xi32, #tpu.memory_space<smem>>
    %c3_i32 = arith.constant 3 : i32
    %c3_i32_9 = arith.constant 3 : i32
    %c0_i32_10 = arith.constant 0 : i32
    %22 = tpu.memref_slice %arg1[%21, %c0_i32_10] : memref<512x128xf32, #tpu.memory_space<any>> -> memref<1x128xf32, #tpu.memory_space<any>>
    %23 = tpu.memref_squeeze %22 : memref<1x128xf32, #tpu.memory_space<any>> -> memref<128xf32, #tpu.memory_space<any>>
    %c0_i32_11 = arith.constant 0 : i32
    %24 = tpu.memref_slice %arg2[%c3_i32, %c0_i32_11] : memref<16x128xf32, #tpu.memory_space<any>> -> memref<1x128xf32, #tpu.memory_space<any>>
    %25 = tpu.memref_squeeze %24 : memref<1x128xf32, #tpu.memory_space<any>> -> memref<128xf32, #tpu.memory_space<any>>
    %26 = tpu.memref_slice %arg3[%c3_i32_9] : memref<8x!tpu.dma_semaphore, #tpu.memory_space<semaphore_mem>> -> memref<1x!tpu.dma_semaphore, #tpu.memory_space<semaphore_mem>>
    %27 = tpu.memref_squeeze %26 : memref<1x!tpu.dma_semaphore, #tpu.memory_space<semaphore_mem>> -> memref<!tpu.dma_semaphore, #tpu.memory_space<semaphore_mem>>
    tpu.enqueue_dma source(%23 : memref<128xf32, #tpu.memory_space<any>>) target(%25 : memref<128xf32, #tpu.memory_space<any>>) target_semaphore(%27 : memref<!tpu.dma_semaphore, #tpu.memory_space<semaphore_mem>>)
    %c4 = arith.constant 4 : index
    %28 = memref.load %arg0[%c4] : memref<16xi32, #tpu.memory_space<smem>>
    %c4_i32 = arith.constant 4 : i32
    %c4_i32_12 = arith.constant 4 : i32
    %c0_i32_13 = arith.constant 0 : i32
    %29 = tpu.memref_slice %arg1[%28, %c0_i32_13] : memref<512x128xf32, #tpu.memory_space<any>> -> memref<1x128xf32, #tpu.memory_space<any>>
    %30 = tpu.memref_squeeze %29 : memref<1x128xf32, #tpu.memory_space<any>> -> memref<128xf32, #tpu.memory_space<any>>
    %c0_i32_14 = arith.constant 0 : i32
    %31 = tpu.memref_slice %arg2[%c4_i32, %c0_i32_14] : memref<16x128xf32, #tpu.memory_space<any>> -> memref<1x128xf32, #tpu.memory_space<any>>
    %32 = tpu.memref_squeeze %31 : memref<1x128xf32, #tpu.memory_space<any>> -> memref<128xf32, #tpu.memory_space<any>>
    %33 = tpu.memref_slice %arg3[%c4_i32_12] : memref<8x!tpu.dma_semaphore, #tpu.memory_space<semaphore_mem>> -> memref<1x!tpu.dma_semaphore, #tpu.memory_space<semaphore_mem>>
    %34 = tpu.memref_squeeze %33 : memref<1x!tpu.dma_semaphore, #tpu.memory_space<semaphore_mem>> -> memref<!tpu.dma_semaphore, #tpu.memory_space<semaphore_mem>>
    tpu.enqueue_dma source(%30 : memref<128xf32, #tpu.memory_space<any>>) target(%32 : memref<128xf32, #tpu.memory_space<any>>) target_semaphore(%34 : memref<!tpu.dma_semaphore, #tpu.memory_space<semaphore_mem>>)
    %c5 = arith.constant 5 : index
    %35 = memref.load %arg0[%c5] : memref<16xi32, #tpu.memory_space<smem>>
    %c5_i32 = arith.constant 5 : i32
    %c5_i32_15 = arith.constant 5 : i32
    %c0_i32_16 = arith.constant 0 : i32
    %36 = tpu.memref_slice %arg1[%35, %c0_i32_16] : memref<512x128xf32, #tpu.memory_space<any>> -> memref<1x128xf32, #tpu.memory_space<any>>
    %37 = tpu.memref_squeeze %36 : memref<1x128xf32, #tpu.memory_space<any>> -> memref<128xf32, #tpu.memory_space<any>>
    %c0_i32_17 = arith.constant 0 : i32
    %38 = tpu.memref_slice %arg2[%c5_i32, %c0_i32_17] : memref<16x128xf32, #tpu.memory_space<any>> -> memref<1x128xf32, #tpu.memory_space<any>>
    %39 = tpu.memref_squeeze %38 : memref<1x128xf32, #tpu.memory_space<any>> -> memref<128xf32, #tpu.memory_space<any>>
    %40 = tpu.memref_slice %arg3[%c5_i32_15] : memref<8x!tpu.dma_semaphore, #tpu.memory_space<semaphore_mem>> -> memref<1x!tpu.dma_semaphore, #tpu.memory_space<semaphore_mem>>
    %41 = tpu.memref_squeeze %40 : memref<1x!tpu.dma_semaphore, #tpu.memory_space<semaphore_mem>> -> memref<!tpu.dma_semaphore, #tpu.memory_space<semaphore_mem>>
    tpu.enqueue_dma source(%37 : memref<128xf32, #tpu.memory_space<any>>) target(%39 : memref<128xf32, #tpu.memory_space<any>>) target_semaphore(%41 : memref<!tpu.dma_semaphore, #tpu.memory_space<semaphore_mem>>)
    %c6 = arith.constant 6 : index
    %42 = memref.load %arg0[%c6] : memref<16xi32, #tpu.memory_space<smem>>
    %c6_i32 = arith.constant 6 : i32
    %c6_i32_18 = arith.constant 6 : i32
    %c0_i32_19 = arith.constant 0 : i32
    %43 = tpu.memref_slice %arg1[%42, %c0_i32_19] : memref<512x128xf32, #tpu.memory_space<any>> -> memref<1x128xf32, #tpu.memory_space<any>>
    %44 = tpu.memref_squeeze %43 : memref<1x128xf32, #tpu.memory_space<any>> -> memref<128xf32, #tpu.memory_space<any>>
    %c0_i32_20 = arith.constant 0 : i32
    %45 = tpu.memref_slice %arg2[%c6_i32, %c0_i32_20] : memref<16x128xf32, #tpu.memory_space<any>> -> memref<1x128xf32, #tpu.memory_space<any>>
    %46 = tpu.memref_squeeze %45 : memref<1x128xf32, #tpu.memory_space<any>> -> memref<128xf32, #tpu.memory_space<any>>
    %47 = tpu.memref_slice %arg3[%c6_i32_18] : memref<8x!tpu.dma_semaphore, #tpu.memory_space<semaphore_mem>> -> memref<1x!tpu.dma_semaphore, #tpu.memory_space<semaphore_mem>>
    %48 = tpu.memref_squeeze %47 : memref<1x!tpu.dma_semaphore, #tpu.memory_space<semaphore_mem>> -> memref<!tpu.dma_semaphore, #tpu.memory_space<semaphore_mem>>
    tpu.enqueue_dma source(%44 : memref<128xf32, #tpu.memory_space<any>>) target(%46 : memref<128xf32, #tpu.memory_space<any>>) target_semaphore(%48 : memref<!tpu.dma_semaphore, #tpu.memory_space<semaphore_mem>>)
    %c7 = arith.constant 7 : index
    %49 = memref.load %arg0[%c7] : memref<16xi32, #tpu.memory_space<smem>>
    %c7_i32 = arith.constant 7 : i32
    %c7_i32_21 = arith.constant 7 : i32
    %c0_i32_22 = arith.constant 0 : i32
    %50 = tpu.memref_slice %arg1[%49, %c0_i32_22] : memref<512x128xf32, #tpu.memory_space<any>> -> memref<1x128xf32, #tpu.memory_space<any>>
    %51 = tpu.memref_squeeze %50 : memref<1x128xf32, #tpu.memory_space<any>> -> memref<128xf32, #tpu.memory_space<any>>
    %c0_i32_23 = arith.constant 0 : i32
    %52 = tpu.memref_slice %arg2[%c7_i32, %c0_i32_23] : memref<16x128xf32, #tpu.memory_space<any>> -> memref<1x128xf32, #tpu.memory_space<any>>
    %53 = tpu.memref_squeeze %52 : memref<1x128xf32, #tpu.memory_space<any>> -> memref<128xf32, #tpu.memory_space<any>>
    %54 = tpu.memref_slice %arg3[%c7_i32_21] : memref<8x!tpu.dma_semaphore, #tpu.memory_space<semaphore_mem>> -> memref<1x!tpu.dma_semaphore, #tpu.memory_space<semaphore_mem>>
    %55 = tpu.memref_squeeze %54 : memref<1x!tpu.dma_semaphore, #tpu.memory_space<semaphore_mem>> -> memref<!tpu.dma_semaphore, #tpu.memory_space<semaphore_mem>>
    tpu.enqueue_dma source(%51 : memref<128xf32, #tpu.memory_space<any>>) target(%53 : memref<128xf32, #tpu.memory_space<any>>) target_semaphore(%55 : memref<!tpu.dma_semaphore, #tpu.memory_space<semaphore_mem>>)
    %c0_i32_24 = arith.constant 0 : i32
    %c16_i32 = arith.constant 16 : i32
    %56 = arith.addi %c0_i32_24, %c16_i32 : i32
    %c1_i32_25 = arith.constant 1 : i32
    scf.for %arg4 = %c0_i32_24 to %56 step %c1_i32_25  : i32 {
      %c1_i32_27 = arith.constant 1 : i32
      %57 = arith.muli %arg4, %c1_i32_27 : i32
      %c0_i32_28 = arith.constant 0 : i32
      %58 = arith.addi %c0_i32_28, %57 : i32
      %c7_i32_29 = arith.constant 7 : i32
      %59 = arith.andi %58, %c7_i32_29 : i32
      %60 = arith.index_cast %58 : i32 to index
      %61 = memref.load %arg0[%60] : memref<16xi32, #tpu.memory_space<smem>>
      %c0_i32_30 = arith.constant 0 : i32
      %62 = tpu.memref_slice %arg1[%61, %c0_i32_30] : memref<512x128xf32, #tpu.memory_space<any>> -> memref<1x128xf32, #tpu.memory_space<any>>
      %63 = tpu.memref_squeeze %62 : memref<1x128xf32, #tpu.memory_space<any>> -> memref<128xf32, #tpu.memory_space<any>>
      %c0_i32_31 = arith.constant 0 : i32
      %64 = tpu.memref_slice %arg2[%58, %c0_i32_31] : memref<16x128xf32, #tpu.memory_space<any>> -> memref<1x128xf32, #tpu.memory_space<any>>
      %65 = tpu.memref_squeeze %64 : memref<1x128xf32, #tpu.memory_space<any>> -> memref<128xf32, #tpu.memory_space<any>>
      %66 = tpu.memref_slice %arg3[%59] : memref<8x!tpu.dma_semaphore, #tpu.memory_space<semaphore_mem>> -> memref<1x!tpu.dma_semaphore, #tpu.memory_space<semaphore_mem>>
      %67 = tpu.memref_squeeze %66 : memref<1x!tpu.dma_semaphore, #tpu.memory_space<semaphore_mem>> -> memref<!tpu.dma_semaphore, #tpu.memory_space<semaphore_mem>>
      tpu.wait_dma2 semaphore(%67 : memref<!tpu.dma_semaphore, #tpu.memory_space<semaphore_mem>>) src(%63 : memref<128xf32, #tpu.memory_space<any>>) dst(%65 : memref<128xf32, #tpu.memory_space<any>>)
      %c8_i32 = arith.constant 8 : i32
      %68 = arith.addi %58, %c8_i32 : i32
      %c16_i32_32 = arith.constant 16 : i32
      %69 = arith.cmpi slt, %68, %c16_i32_32 : i32
      %70 = arith.extui %69 : i1 to i32
      %c0_i32_33 = arith.constant 0 : i32
      %71 = arith.cmpi ne, %70, %c0_i32_33 : i32
      scf.if %71 {
        %c8_i32_34 = arith.constant 8 : i32
        %72 = arith.addi %58, %c8_i32_34 : i32
        %73 = arith.index_cast %72 : i32 to index
        %74 = memref.load %arg0[%73] : memref<16xi32, #tpu.memory_space<smem>>
        %c0_i32_35 = arith.constant 0 : i32
        %75 = tpu.memref_slice %arg1[%74, %c0_i32_35] : memref<512x128xf32, #tpu.memory_space<any>> -> memref<1x128xf32, #tpu.memory_space<any>>
        %76 = tpu.memref_squeeze %75 : memref<1x128xf32, #tpu.memory_space<any>> -> memref<128xf32, #tpu.memory_space<any>>
        %c0_i32_36 = arith.constant 0 : i32
        %77 = tpu.memref_slice %arg2[%72, %c0_i32_36] : memref<16x128xf32, #tpu.memory_space<any>> -> memref<1x128xf32, #tpu.memory_space<any>>
        %78 = tpu.memref_squeeze %77 : memref<1x128xf32, #tpu.memory_space<any>> -> memref<128xf32, #tpu.memory_space<any>>
        %79 = tpu.memref_slice %arg3[%59] : memref<8x!tpu.dma_semaphore, #tpu.memory_space<semaphore_mem>> -> memref<1x!tpu.dma_semaphore, #tpu.memory_space<semaphore_mem>>
        %80 = tpu.memref_squeeze %79 : memref<1x!tpu.dma_semaphore, #tpu.memory_space<semaphore_mem>> -> memref<!tpu.dma_semaphore, #tpu.memory_space<semaphore_mem>>
        tpu.enqueue_dma source(%76 : memref<128xf32, #tpu.memory_space<any>>) target(%78 : memref<128xf32, #tpu.memory_space<any>>) target_semaphore(%80 : memref<!tpu.dma_semaphore, #tpu.memory_space<semaphore_mem>>)
      } else {
      }
    }
    %c16_i32_26 = arith.constant 16 : i32
    return
  }
}

</mosaic_0001>

<bundles_post_ra>
// kernel: tpu_custom_call.1
= control target key start
LH: loop header
LB: loop body
LE: loop exit
PB: predicated region body
PF: predicated region fallthrough
CT: control target
= control target key end

     0   :  { %7 = vsyncpa [#allocation4], 0  ;;  %s297_s9 = smov [#allocation3]   ;;  %s398_s0 = inlined_call_operand.hbm [shape: s32[16], index: 0, kind: input, shape index: {}]   ;;  %s399_s1 = inlined_call_operand.hbm [shape: f32[512,128], index: 1, kind: input, shape index: {}]   ;;  %s400_s2 = inlined_call_operand.hbm [shape: f32[16,128], index: 2, kind: output, shape index: {}]  }
   0x1   :  { %15 = dma.hbm_to_smem %s398_s0, 16, %s297_s9, [#allocation4]  }
   0x2   :  { %289 = dma.done.wait [#allocation4], 16  }
   0x3   :  { %290 = vsyncadd [#allocation4], 4294967280 }
   0x4   :  { %19 = sfence }
   0x5   :  { %s20_s12 = sld [smem:[#allocation3]]  ;;  %s298_s17 = smov [#allocation2]  }
   0x6   :  { %s299_s18 = smov 131072   ;;  %s300_s19 = smov 0  }
   0x7   :  { %s33_s24 = scalar_lea.hbm %s400_s2, 16  ;;  %s301_s29 = smov [#allocation2 + $0x1]  }
   0x8   :  { %s45_s5 = scalar_lea.hbm %s400_s2, 32  ;;  %s302_s10 = smov [#allocation2 + $0x2]  }
   0x9   :  { %s57_s14 = scalar_lea.hbm %s400_s2, 48  ;;  %s303_s21 = smov [#allocation2 + $0x3]  }
   0xb   :  { %s225_s13 = sshll.u32 %s20_s12, 4 }
   0xc   :  { %s22_s16 = scalar_lea.hbm %s399_s1, %s225_s13 }
   0xd   :  { %29 = dma.general %s22_s16, 16, %s400_s2, %s298_s17, %s299_s18, [#allocation6], %s300_s19, 0  }
   0xe   :  { %s226_s22 = sld [smem:[#allocation3 + $0x1]] }
  0x14   :  { %s227_s25 = sshll.u32 %s226_s22, 4 }
  0x15   :  { %s32_s28 = scalar_lea.hbm %s399_s1, %s227_s25 }
  0x16   :  { %41 = dma.general %s32_s28, 16, %s33_s24, %s301_s29, %s299_s18, [#allocation8], %s300_s19, 0  }
  0x17   :  { %s228_s30 = sld [smem:[#allocation3 + $0x2]]  ;;  %s69_s24 = scalar_lea.hbm %s400_s2, 64 }
  0x18   :  { %s304_s29 = smov [#allocation2 + $0x4]  }
  0x1d   :  { %s229_s6 = sshll.u32 %s228_s30, 4 }
  0x1e   :  { %s44_s9 = scalar_lea.hbm %s399_s1, %s229_s6 }
  0x1f   :  { %53 = dma.general %s44_s9, 16, %s45_s5, %s302_s10, %s299_s18, [#allocation10], %s300_s19, 0  }
  0x20   :  { %s230_s11 = sld [smem:[#allocation3 + $0x3]]  ;;  %s81_s5 = scalar_lea.hbm %s400_s2, 80 }
  0x21   :  { %s305_s10 = smov [#allocation2 + $0x5]  }
  0x26   :  { %s231_s15 = sshll.u32 %s230_s11, 4 }
  0x27   :  { %s56_s20 = scalar_lea.hbm %s399_s1, %s231_s15 }
  0x28   :  { %65 = dma.general %s56_s20, 16, %s57_s14, %s303_s21, %s299_s18, [#allocation12], %s300_s19, 0  }
  0x29   :  { %s232_s22 = sld [smem:[#allocation3 + $0x4]]  ;;  %s93_s14 = scalar_lea.hbm %s400_s2, 96 }
  0x2a   :  { %s306_s21 = smov [#allocation2 + $0x6]  }
  0x2f   :  { %s233_s25 = sshll.u32 %s232_s22, 4 }
  0x30   :  { %s68_s28 = scalar_lea.hbm %s399_s1, %s233_s25 }
  0x31   :  { %77 = dma.general %s68_s28, 16, %s69_s24, %s304_s29, %s299_s18, [#allocation14], %s300_s19, 0  }
  0x32   :  { %s234_s30 = sld [smem:[#allocation3 + $0x5]]  ;;  %s105_s24 = scalar_lea.hbm %s400_s2, 112 }
  0x33   :  { %s307_s29 = smov [#allocation2 + $0x7]  }
  0x38   :  { %s235_s6 = sshll.u32 %s234_s30, 4  ;;  %s293_s30 = smov 0  }
  0x39   :  { %s80_s9 = scalar_lea.hbm %s399_s1, %s235_s6 }
  0x3a   :  { %89 = dma.general %s80_s9, 16, %s81_s5, %s305_s10, %s299_s18, [#allocation16], %s300_s19, 0  }
  0x3b   :  { %s236_s11 = sld [smem:[#allocation3 + $0x6]] }
  0x41   :  { %s237_s15 = sshll.u32 %s236_s11, 4 }
  0x42   :  { %s92_s20 = scalar_lea.hbm %s399_s1, %s237_s15 }
  0x43   :  { %101 = dma.general %s92_s20, 16, %s93_s14, %s306_s21, %s299_s18, [#allocation18], %s300_s19, 0  }
  0x44   :  { %s238_s22 = sld [smem:[#allocation3 + $0x7]] }
  0x4a   :  { %s239_s25 = sshll.u32 %s238_s22, 4 }
  0x4b   :  { %s104_s28 = scalar_lea.hbm %s399_s1, %s239_s25 }
  0x4c   :  { %113 = dma.general %s104_s28, 16, %s105_s24, %s307_s29, %s299_s18, [#allocation20], %s300_s19, 0  }
  0x4d LB: > { %s120_s3 = sand.u32 7, %s295_s30  ;;  %s295_s30 = sphi %s293_s30, %s119_s30  }
  0x4e   : > { %s122_s4 = scalar_lea.sflag [#allocation2], %s120_s3 }
  0x4f   : > { %291 = dma.done.wait %s122_s4, 16 }
  0x50   : > { %292 = vsyncadd %s122_s4, 4294967280  ;;  %s125_s5 = sadd.s32 8, %s295_s30  ;;  %s242_s7 = sshll.u32 %s295_s30, 4 }
  0x51   : > { %p255_p0 = scmp.lt.s32.totalorder %s125_s5, 16  ;;  %s218_s11 = scalar_lea.hbm %s400_s2, %s242_s7 }
  0x52   : > { %s219_s12 = scalar_lea.hbm %s218_s11, 128  ;;  %s308_s15 = smov 131072  }
  0x53   : > { %s252_s6 = scalar_select %p255_p0, [#allocation3], [#allocation23] }
  0x54   : > { %s402_s5 = smov (!%p255_p0, %s125_s5), 0  ;;  %s309_s16 = smov 0  }
  0x55   : > { %s130_s8 = sld [smem:[%s252_s6 + %s402_s5]]  ;;  %s119_s30 = sadd.s32 1, %s295_s30  }
  0x56   : > { %p116_p1 = scmp.ge.s32.totalorder %s119_s30, 16  }
  0x59   :  { %118 = sbr.rel (!%p116_p1) target bundleno = 77 (0x4d), region = 63 }
  0x5b   : > { %s241_s18 = sshll.u32 %s130_s8, 4 }
  0x5c   : > { %s132_s14 = scalar_lea.hbm %s399_s1, %s241_s18 }
  0x5d   : > { %254 = dma.general (%p255_p0), %s132_s14, 16, %s219_s12, %s122_s4, %s308_s15, [#allocation22], %s309_s16, 0  }
  0x5e   :  { %142 = vsyncpa [#allocation4], 1 }
  0x5f   :  { %143 = vsyncmov [#allocation2] }
  0x62   :  { %s144_s17 = vpop.sfrf %143 }
  0x63   :  { %p243_p2 = scmp.ne.s32.totalorder %s144_s17, 0 }
  0x65   :  { %148 = shalt.err (%p243_p2)  }
  0x66   :  { %150 = vsyncmov [#allocation2 + $0x1] }
  0x69   :  { %s151_s20 = vpop.sfrf %150 }
  0x6a   :  { %p244_p3 = scmp.ne.s32.totalorder %s151_s20, 0 }
  0x6c   :  { %155 = shalt.err (%p244_p3)  }
  0x6d   :  { %157 = vsyncmov [#allocation2 + $0x2] }
  0x70   :  { %s158_s21 = vpop.sfrf %157 }
  0x71   :  { %p245_p4 = scmp.ne.s32.totalorder %s158_s21, 0 }
  0x73   :  { %162 = shalt.err (%p245_p4)  }
  0x74   :  { %164 = vsyncmov [#allocation2 + $0x3] }
  0x77   :  { %s165_s22 = vpop.sfrf %164 }
  0x78   :  { %p246_p5 = scmp.ne.s32.totalorder %s165_s22, 0 }
  0x7a   :  { %169 = shalt.err (%p246_p5)  }
  0x7b   :  { %171 = vsyncmov [#allocation2 + $0x4] }
  0x7e   :  { %s172_s0 = vpop.sfrf %171 }
  0x7f   :  { %p247_p6 = scmp.ne.s32.totalorder %s172_s0, 0 }
  0x81   :  { %176 = shalt.err (%p247_p6)  }
  0x82   :  { %178 = vsyncmov [#allocation2 + $0x5] }
  0x85   :  { %s179_s1 = vpop.sfrf %178 }
  0x86   :  { %p248_p7 = scmp.ne.s32.totalorder %s179_s1, 0 }
  0x88   :  { %183 = shalt.err (%p248_p7)  }
  0x89   :  { %185 = vsyncmov [#allocation2 + $0x6] }
  0x8c   :  { %s186_s2 = vpop.sfrf %185 }
  0x8d   :  { %p249_p8 = scmp.ne.s32.totalorder %s186_s2, 0 }
  0x8f   :  { %190 = shalt.err (%p249_p8)  }
  0x90   :  { %192 = vsyncmov [#allocation2 + $0x7] }
  0x93   :  { %s193_s23 = vpop.sfrf %192 }
  0x94   :  { %p250_p9 = scmp.ne.s32.totalorder %s193_s23, 0 }
  0x96   :  { %197 = shalt.err (%p250_p9)  }

</bundles_post_ra>
